<compile_context>
chip_gen: v6e
topology: v6e:2x2x1
jax: 0.10.0
libtpu: 0.0.40
codegen_flags: <defaults>
</compile_context>

<pallas_src>
import math
from typing import NamedTuple

import jax
import jax.numpy as jnp
from jax.experimental import pallas as pl
from jax.experimental.pallas import tpu as pltpu


def _round_up(x, m):
    return ((x + m - 1) // m) * m


def _choose_tile(n, cap, align):
    """Tile <= cap, multiple of align, minimizing padded waste of n."""
    cap = max(align, (cap // align) * align)
    n_al = _round_up(max(n, 1), align)
    if n_al <= cap:
        return n_al
    nblocks = -(-n_al // cap)                      # ceil
    return min(cap, _round_up(-(-n // nblocks), align))


def _pad2d(a, rows, cols):
    pr, pc = rows - a.shape[0], cols - a.shape[1]
    if pr or pc:
        a = jnp.pad(a, ((0, pr), (0, pc)))
    return a


def lstm_cell_kernel(x_ref, h_ref, wx_ref, wh_ref, b_ref, c_ref,
                     new_h_ref, new_c_ref):
    # g = [x, h] @ W^T + b as two MXU matmuls (no concat, full K in-block:
    # no accumulator scratch, no pl.when init/finalize).
    g = jnp.dot(x_ref[...], wx_ref[...], preferred_element_type=jnp.float32)
    g = g + jnp.dot(h_ref[...], wh_ref[...], preferred_element_type=jnp.float32)
    g = g + b_ref[...].astype(jnp.float32)

    # Shared gate => only two distinct transcendentals of g; compute each once.
    # (Further EUP trimming via exp(-g)+pl.reciprocal(approx=True) only if
    # profiling shows the epilogue EUP-bound; kept exact here.)
    s = jax.nn.sigmoid(g)          # == f_gate == o_gate
    t = jnp.tanh(g)                # == i_gate == c_gate
    cell = c_ref[...].astype(jnp.float32)
    new_cell = cell * s + t * t
    new_hidden = jnp.tanh(new_cell) * s
    new_h_ref[...] = new_hidden.astype(new_h_ref.dtype)
    new_c_ref[...] = new_cell.astype(new_c_ref.dtype)


class LSTMCellParams(NamedTuple):
    wxT: jax.Array    # (Cin_p, Chp)  pre-transposed, pre-padded, pre-cast
    whT: jax.Array    # (Ch_kp, Chp)
    bias: jax.Array   # (1, Chp) float32
    in_channels: int
    hidden_channels: int
    tn: int           # output-column tile (multiple of 128, divides Chp)


_WEIGHT_PANEL_BUDGET = 24 << 20   # double-buffered resident weight panels


def prepare_params(weight, bias, compute_dtype=None, tn_cap=512):
    """Hoisted off the per-step path: split/transpose/pad/cast the gate weight ONCE.

    weight: (Ch, Cin+Ch) PyTorch nn.Linear layout; bias: (Ch,).
    compute_dtype: jnp.bfloat16 halves weight HBM bytes and runs at full MXU
    rate on v5e, v6e and v7x alike (gate math stays f32 in-kernel).
    # TODO(synk): optional int8 (v5e/v6e) / fp8 (v7x) weight quantization for
    # a further ~2x HBM reduction in the weight-bandwidth-bound regime.
    """
    Ch, K = weight.shape
    Cin = K - Ch
    assert Cin > 0 and bias.shape == (Ch,)

    wsize = jnp.dtype(compute_dtype if compute_dtype is not None
                      else weight.dtype).itemsize
    Cin_p = _round_up(Cin, 128)
    Ch_kp = _round_up(Ch, 128)

    # Output-column tile: minimize padding waste, but keep the double-buffered
    # resident weight panel ((Cin_p + Ch_kp) x tn) inside a VMEM budget that
    # is portable to v7x's 64 MiB physical VMEM.
    tn = _choose_tile(Ch, tn_cap, 128)
    while tn > 128 and 2 * (Cin_p + Ch_kp) * tn * wsize > _WEIGHT_PANEL_BUDGET:
        tn = max(128, _round_up(tn // 2, 128))
    Chp = _round_up(Ch, tn)

    wxT = weight[:, :Cin].T          # (Cin, Ch)
    whT = weight[:, Cin:].T          # (Ch, Ch)
    if compute_dtype is not None:
        wxT = wxT.astype(compute_dtype)
        whT = whT.astype(compute_dtype)
    wxT = _pad2d(wxT, Cin_p, Chp)
    whT = _pad2d(whT, Ch_kp, Chp)
    b2 = _pad2d(bias.reshape(1, -1).astype(jnp.float32), 1, Chp)
    return LSTMCellParams(wxT, whT, b2, Cin, Ch, tn)


def lstm_cell_forward(x, h, cell, params, *, tm_cap=256):
    """One LSTMCell step. params from prepare_params (weights already padded)."""
    wxT, whT, b2, Cin, Ch, tn = params
    B = x.shape[0]
    assert x.shape == (B, Cin) and h.shape == (B, Ch) and cell.shape == (B, Ch)
    Cin_p, Chp = wxT.shape
    Ch_kp = whT.shape[0]
    compute_dtype = wxT.dtype
    h_dtype, c_dtype = h.dtype, cell.dtype

    # Batch tile: packed-sublane aligned for the compute dtype (8 f32 /
    # 16 bf16 / 32 int8) and chosen to minimize batch-padding waste.
    sub = 8 * max(1, 4 // jnp.dtype(compute_dtype).itemsize)
    tm = _choose_tile(B, tm_cap, sub)
    Bp = _round_up(B, tm)

    n_i = Bp // tm                  # batch blocks   (innermost grid axis)
    n_j = Chp // tn                 # N (out-column) blocks (outermost axis)
    # v7x megacore: expose >= 2 parallel blocks when the grid would collapse
    # to a single program, so both TensorCores get work.
    if n_i * n_j == 1 and Chp % 256 == 0:
        tn, n_j = Chp // 2, 2

    # Only the small activations are padded/cast per step; weights were
    # padded/cast once in prepare_params.
    x_p = _pad2d(x.astype(compute_dtype), Bp, Cin_p)
    h_p = _pad2d(h.astype(compute_dtype), Bp, Ch_kp)
    c_p = _pad2d(cell, Bp, Chp)

    # Batch innermost -> weight/bias block index depends only on the outer
    # axis j, so the weight panel stays resident in VMEM (no re-DMA per
    # batch tile); only x / h / cell / outputs stream.
    grid = (n_j, n_i)

    grid_spec = pltpu.PrefetchScalarGridSpec(
        num_scalar_prefetch=0,
        grid=grid,
        in_specs=[
            pl.BlockSpec((tm, Cin_p), lambda j, i: (i, 0)),    # x
            pl.BlockSpec((tm, Ch_kp), lambda j, i: (i, 0)),    # h
            pl.BlockSpec((Cin_p, tn), lambda j, i: (0, j)),    # Wx^T (resident)
            pl.BlockSpec((Ch_kp, tn), lambda j, i: (0, j)),    # Wh^T (resident)
            pl.BlockSpec((1, tn),     lambda j, i: (0, j)),    # bias
            pl.BlockSpec((tm, tn),    lambda j, i: (i, j)),    # cell
        ],
        out_specs=(
            pl.BlockSpec((tm, tn), lambda j, i: (i, j)),       # new_hidden
            pl.BlockSpec((tm, tn), lambda j, i: (i, j)),       # new_cell
        ),
    )

    # Always set the scoped-VMEM limit explicitly (v5e's default is ~16 MiB);
    # cap at 48 MiB so the same plan fits v7x's 64 MiB physical VMEM.
    wsz = jnp.dtype(compute_dtype).itemsize
    vmem_est = 2 * (tm * Cin_p * wsz + tm * Ch_kp * wsz
                    + Cin_p * tn * wsz + Ch_kp * tn * wsz + tn * 4
                    + tm * tn * jnp.dtype(c_dtype).itemsize      # cell in
                    + tm * tn * jnp.dtype(h_dtype).itemsize      # new_h out
                    + tm * tn * jnp.dtype(c_dtype).itemsize)     # new_c out
    vmem_limit = int(min(max(2 * vmem_est, 16 << 20), 48 << 20))

    new_h_p, new_c_p = pl.pallas_call(
        lstm_cell_kernel,
        out_shape=(jax.ShapeDtypeStruct((Bp, Chp), h_dtype),
                   jax.ShapeDtypeStruct((Bp, Chp), c_dtype)),
        grid_spec=grid_spec,
        compiler_params=pltpu.CompilerParams(
            dimension_semantics=("parallel", "parallel"),
            vmem_limit_bytes=vmem_limit),
    )(x_p, h_p, wxT, whT, b2, c_p)

    # TODO(synk): when this cell is driven over T timesteps, fold the time
    # loop into the kernel (grid over T, weight index invariant over t, h/c
    # carried in VMEM scratch) so the weight is DMA'd once per sequence.
    return new_h_p[:B, :Ch], new_c_p[:B, :Ch]


def init_params(key, in_channels, hidden_channels, dtype=jnp.float32):
    # PyTorch reset_parameters: uniform(-stdv, stdv), stdv = 1/sqrt(hidden)
    # (the original references self.hidden_size, a bug; hidden_channels used.)
    stdv = 1.0 / math.sqrt(hidden_channels)
    kw, kb = jax.random.split(key)
    weight = jax.random.uniform(
        kw, (hidden_channels, in_channels + hidden_channels),
        minval=-stdv, maxval=stdv, dtype=dtype)
    bias = jax.random.uniform(
        kb, (hidden_channels,), minval=-stdv, maxval=stdv, dtype=dtype)
    return weight, bias


def reference_forward(x, h, cell, weight, bias):
    combined = jnp.concatenate([x, h], axis=1)
    g = combined @ weight.T + bias
    f_gate = jax.nn.sigmoid(g)
    i_gate = jnp.tanh(g)
    c_gate = jnp.tanh(g)
    o_gate = jax.nn.sigmoid(g)
    new_cell = cell * f_gate + i_gate * c_gate
    new_hidden = jnp.tanh(new_cell) * o_gate
    return new_hidden, new_cell


if __name__ == "__main__":
    B, Cin, Ch = 2, 16, 32
    key = jax.random.PRNGKey(0)
    k_x, k_h, k_c, k_p = jax.random.split(key, 4)

    x = jax.random.normal(k_x, (B, Cin), dtype=jnp.float32)
    h = jax.random.normal(k_h, (B, Ch), dtype=jnp.float32)
    cell = jax.random.normal(k_c, (B, Ch), dtype=jnp.float32)
    weight, bias = init_params(k_p, Cin, Ch)

    # One-time parameter prep (split + transpose + pad + optional bf16 cast).
    # Kept f32 here so the demo matches the f32 reference to tight tolerance;
    # pass compute_dtype=jnp.bfloat16 in production on v5e/v6e/v7x.
    params = prepare_params(weight, bias)

    new_h, new_c = lstm_cell_forward(x, h, cell, params)
    jax.block_until_ready((new_h, new_c))

    ref_h, ref_c = reference_forward(x, h, cell, weight, bias)
    assert jnp.allclose(new_h, ref_h, atol=1e-5, rtol=1e-5)
    assert jnp.allclose(new_c, ref_c, atol=1e-5, rtol=1e-5)

    print("KERNEL_OK")
</pallas_src>

<mosaic_0001>
module attributes {stable_mosaic.version = 11 : i64} {
  func.func @lstm_cell_kernel(%arg0: i32, %arg1: i32, %arg2: memref<8x128xf32, #tpu.memory_space<vmem>>, %arg3: memref<8x128xf32, #tpu.memory_space<vmem>>, %arg4: memref<128x128xf32, #tpu.memory_space<vmem>>, %arg5: memref<128x128xf32, #tpu.memory_space<vmem>>, %arg6: memref<1x128xf32, #tpu.memory_space<vmem>>, %arg7: memref<8x128xf32, #tpu.memory_space<vmem>>, %arg8: memref<8x128xf32, #tpu.memory_space<vmem>>, %arg9: memref<8x128xf32, #tpu.memory_space<vmem>>) attributes {dimension_semantics = [#tpu.dimension_semantics<parallel>, #tpu.dimension_semantics<parallel>], iteration_bounds = array<i64: 1, 1>, scalar_prefetch = 0 : i64, scratch_operands = 0 : i64, tpu.core_type = #tpu.core_type<tc>, window_params = [{transform_indices = @transform_0, window_bounds = array<i64: 8, 128>}, {transform_indices = @transform_1, window_bounds = array<i64: 8, 128>}, {transform_indices = @transform_2, window_bounds = array<i64: 128, 128>}, {transform_indices = @transform_3, window_bounds = array<i64: 128, 128>}, {transform_indices = @transform_4, window_bounds = array<i64: 1, 128>}, {transform_indices = @transform_5, window_bounds = array<i64: 8, 128>}, {transform_indices = @transform_6, window_bounds = array<i64: 8, 128>}, {transform_indices = @transform_7, window_bounds = array<i64: 8, 128>}]} {
    %c0 = arith.constant 0 : index
    %c0_0 = arith.constant 0 : index
    %0 = vector.load %arg2[%c0, %c0_0] : memref<8x128xf32, #tpu.memory_space<vmem>>, vector<8x128xf32>
    %c0_1 = arith.constant 0 : index
    %c0_2 = arith.constant 0 : index
    %1 = vector.load %arg4[%c0_1, %c0_2] : memref<128x128xf32, #tpu.memory_space<vmem>>, vector<128x128xf32>
    %cst = arith.constant dense<0.000000e+00> : vector<8x128xf32>
    %2 = tpu.matmul %0, %1, %cst {dimension_numbers = #tpu.dot_dimension_numbers<[1], [0], [0], [1], [0, 0, 1, 1], [], []>} : vector<8x128xf32>, vector<128x128xf32>, vector<8x128xf32> -> vector<8x128xf32>
    %c0_3 = arith.constant 0 : index
    %c0_4 = arith.constant 0 : index
    %3 = vector.load %arg3[%c0_3, %c0_4] : memref<8x128xf32, #tpu.memory_space<vmem>>, vector<8x128xf32>
    %c0_5 = arith.constant 0 : index
    %c0_6 = arith.constant 0 : index
    %4 = vector.load %arg5[%c0_5, %c0_6] : memref<128x128xf32, #tpu.memory_space<vmem>>, vector<128x128xf32>
    %cst_7 = arith.constant dense<0.000000e+00> : vector<8x128xf32>
    %5 = tpu.matmul %3, %4, %cst_7 {dimension_numbers = #tpu.dot_dimension_numbers<[1], [0], [0], [1], [0, 0, 1, 1], [], []>} : vector<8x128xf32>, vector<128x128xf32>, vector<8x128xf32> -> vector<8x128xf32>
    %6 = arith.addf %2, %5 : vector<8x128xf32>
    %c0_8 = arith.constant 0 : index
    %c0_9 = arith.constant 0 : index
    %7 = vector.load %arg6[%c0_8, %c0_9] : memref<1x128xf32, #tpu.memory_space<vmem>>, vector<1x128xf32>
    %8 = vector.broadcast %7 : vector<1x128xf32> to vector<8x128xf32>
    %9 = arith.addf %6, %8 : vector<8x128xf32>
    %10 = arith.negf %9 : vector<8x128xf32>
    %11 = math.exp %10 : vector<8x128xf32>
    %cst_10 = arith.constant 1.000000e+00 : f32
    %12 = vector.broadcast %cst_10 : f32 to vector<8x128xf32>
    %13 = arith.addf %12, %11 : vector<8x128xf32>
    %14 = arith.divf %12, %13 : vector<8x128xf32>
    %15 = math.tanh %9 : vector<8x128xf32>
    %c0_11 = arith.constant 0 : index
    %c0_12 = arith.constant 0 : index
    %16 = vector.load %arg7[%c0_11, %c0_12] : memref<8x128xf32, #tpu.memory_space<vmem>>, vector<8x128xf32>
    %17 = arith.mulf %16, %14 : vector<8x128xf32>
    %18 = arith.mulf %15, %15 : vector<8x128xf32>
    %19 = arith.addf %17, %18 : vector<8x128xf32>
    %20 = math.tanh %19 : vector<8x128xf32>
    %21 = arith.mulf %20, %14 : vector<8x128xf32>
    %c0_13 = arith.constant 0 : index
    %c0_14 = arith.constant 0 : index
    %22 = vector.load %arg8[%c0_13, %c0_14] : memref<8x128xf32, #tpu.memory_space<vmem>>, vector<8x128xf32>
    tpu.vector_store %arg8[%c0_13, %c0_14], %21 {strides = array<i32>} : memref<8x128xf32, #tpu.memory_space<vmem>>, vector<8x128xf32>,
    %c0_15 = arith.constant 0 : index
    %c0_16 = arith.constant 0 : index
    %23 = vector.load %arg9[%c0_15, %c0_16] : memref<8x128xf32, #tpu.memory_space<vmem>>, vector<8x128xf32>
    tpu.vector_store %arg9[%c0_15, %c0_16], %19 {strides = array<i32>} : memref<8x128xf32, #tpu.memory_space<vmem>>, vector<8x128xf32>,
    return
  }
  func.func @transform_0(%arg0: i32, %arg1: i32) -> (i32, i32) {
    %c0_i32 = arith.constant 0 : i32
    %c0_i32_0 = arith.constant 0 : i32
    return %arg1, %c0_i32 : i32, i32
  }
  func.func @transform_1(%arg0: i32, %arg1: i32) -> (i32, i32) {
    %c0_i32 = arith.constant 0 : i32
    %c0_i32_0 = arith.constant 0 : i32
    return %arg1, %c0_i32 : i32, i32
  }
  func.func @transform_2(%arg0: i32, %arg1: i32) -> (i32, i32) {
    %c0_i32 = arith.constant 0 : i32
    %c0_i32_0 = arith.constant 0 : i32
    return %c0_i32, %arg0 : i32, i32
  }
  func.func @transform_3(%arg0: i32, %arg1: i32) -> (i32, i32) {
    %c0_i32 = arith.constant 0 : i32
    %c0_i32_0 = arith.constant 0 : i32
    return %c0_i32, %arg0 : i32, i32
  }
  func.func @transform_4(%arg0: i32, %arg1: i32) -> (i32, i32) {
    %c0_i32 = arith.constant 0 : i32
    %c0_i32_0 = arith.constant 0 : i32
    return %c0_i32, %arg0 : i32, i32
  }
  func.func @transform_5(%arg0: i32, %arg1: i32) -> (i32, i32) {
    %c0_i32 = arith.constant 0 : i32
    return %arg1, %arg0 : i32, i32
  }
  func.func @transform_6(%arg0: i32, %arg1: i32) -> (i32, i32) {
    %c0_i32 = arith.constant 0 : i32
    return %arg1, %arg0 : i32, i32
  }
  func.func @transform_7(%arg0: i32, %arg1: i32) -> (i32, i32) {
    %c0_i32 = arith.constant 0 : i32
    return %arg1, %arg0 : i32, i32
  }
}

</mosaic_0001>

<bundles_post_ra>
// kernel: tpu_custom_call.1
= control target key start
LH: loop header
LB: loop body
LE: loop exit
PB: predicated region body
PF: predicated region fallthrough
CT: control target
= control target key end

     0   :  { %13 = vsyncpa [#allocation3], 0  ;;  %s668_s0 = inlined_call_operand.hbm [shape: f32[8,128], index: 0, kind: input, shape index: {}]   ;;  %s669_s1 = inlined_call_operand.hbm [shape: f32[8,128], index: 1, kind: input, shape index: {}]   ;;  %s670_s2 = inlined_call_operand.hbm [shape: f32[128,128], index: 2, kind: input, shape index: {}]   ;;  %s671_s3 = inlined_call_operand.hbm [shape: f32[128,128], index: 3, kind: input, shape index: {}]   ;;  %s672_s4 = inlined_call_operand.vmem [shape: f32[1,128], index: 4, kind: input, shape index: {}]   ;;  %s673_s5 = inlined_call_operand.vmem [shape: f32[8,128], index: 5, kind: input, shape index: {}]   ;;  %s674_s6 = inlined_call_operand.hbm [shape: f32[8,128], index: 6, kind: output, shape index: {0}]   ;;  %s675_s7 = inlined_call_operand.hbm [shape: f32[8,128], index: 7, kind: output, shape index: {1}]  }
   0x1   :  { %14 = vsyncpa [#allocation6], 0 }
   0x2   :  { %15 = vsyncpa [#allocation9], 0 }
   0x3   :  { %16 = vsyncpa [#allocation4], 0 }
   0x4   :  { %17 = vsyncpa [#allocation12], 0  ;;  %s560_s24 = smov [#allocation5]   ;;  %s561_s26 = smov [#allocation2]  }
   0x5   :  { %s34_s25 = sshll.u32 %s560_s24, 4  ;;  %s24_s27 = sshll.u32 %s561_s26, 4  ;;  %s35_s25 = int_to_ptr.vmem [resolvable:$true] %s34_s25  ;;  %s25_s27 = int_to_ptr.vmem [resolvable:$true] %s24_s27 }
   0x6   :  { %s438_s28 = scalar_lea.vmem %s35_s25, 128  ;;  %p443_p1 = scmp.lt.s32.totalorder %s35_s25, %s35_s25 }
   0x7   :  { %p439_p0 = scmp.ne.s32.totalorder %s35_s25, %s438_s28  ;;  %p444_p2 = scmp.lt.s32.totalorder %s438_s28, %s438_s28 }
   0x9   :  { %p445_p3 = por %p444_p2, %p443_p1 }
   0xb   :  { %p446_p4 = pnand %p445_p3, %p439_p0 }
   0xd   :  { %449 = shalt.err (!%p446_p4)
}
   0xe   :  { %37 = dma.hbm_to_vmem [thread:$0]  %s669_s1, 128, %s35_s25, [#allocation6]  }
   0xf   :  { %s458_s8 = scalar_lea.vmem %s25_s27, 128  ;;  %p463_p6 = scmp.lt.s32.totalorder %s25_s27, %s25_s27 }
  0x10   :  { %p459_p5 = scmp.ne.s32.totalorder %s25_s27, %s458_s8  ;;  %p464_p7 = scmp.lt.s32.totalorder %s458_s8, %s458_s8 }
  0x12   :  { %p465_p8 = por %p464_p7, %p463_p6 }
  0x14   :  { %p466_p9 = pnand %p465_p8, %p459_p5 }
  0x16   :  { %469 = shalt.err (!%p466_p9)
}
  0x17   :  { %27 = dma.hbm_to_vmem [thread:$0]  %s668_s0, 128, %s25_s27, [#allocation3]  }
  0x18   :  { %s562_s11 = smov [#allocation7]  }
  0x19   :  { %s43_s12 = sshll.u32 %s562_s11, 4  ;;  %s44_s12 = int_to_ptr.vmem [resolvable:$true] %s43_s12 }
  0x1a   :  { %s478_s13 = scalar_lea.vmem %s44_s12, 2048  ;;  %p483_p11 = scmp.lt.s32.totalorder %s44_s12, %s44_s12 }
  0x1b   :  { %p479_p10 = scmp.ne.s32.totalorder %s44_s12, %s478_s13  ;;  %p484_p12 = scmp.lt.s32.totalorder %s478_s13, %s478_s13 }
  0x1d   :  { %p485_p13 = por %p484_p12, %p483_p11 }
  0x1f   :  { %p486_p0 = pnand %p485_p13, %p479_p10 }
  0x21   :  { %489 = shalt.err (!%p486_p0)
}
  0x22   :  { %s563_s1 = smov 128   ;;  %s564_s14 = smov 8  }
  0x23   :  { %49 = dma.hbm_to_vmem [thread:$0]  %s670_s2, 2048, %s44_s12, [#allocation6], %s563_s1, %s563_s1, %s564_s14  }
  0x24   :  { %s565_s17 = smov [#allocation8]  }
  0x25   :  { %s55_s18 = sshll.u32 %s565_s17, 4  ;;  %s56_s18 = int_to_ptr.vmem [resolvable:$true] %s55_s18 }
  0x26   :  { %s498_s0 = scalar_lea.vmem %s56_s18, 2048  ;;  %p503_p2 = scmp.lt.s32.totalorder %s56_s18, %s56_s18 }
  0x27   :  { %p499_p1 = scmp.ne.s32.totalorder %s56_s18, %s498_s0  ;;  %p504_p3 = scmp.lt.s32.totalorder %s498_s0, %s498_s0 }
  0x29   :  { %p505_p4 = por %p504_p3, %p503_p2 }
  0x2b   :  { %p506_p5 = pnand %p505_p4, %p499_p1 }
  0x2d   :  { %509 = shalt.err (!%p506_p5)
}
  0x2e   :  { %61 = dma.hbm_to_vmem [thread:$0]  %s671_s3, 2048, %s56_s18, [#allocation9], %s563_s1, %s563_s1, %s564_s14  }
  0x2f   :  { %550 = dma.done.wait [#allocation3], 128  }
  0x30   :  { %551 = vsyncadd [#allocation3], 4294967168 }
  0x31   :  { %552 = dma.done.wait [#allocation6], 2176  }
  0x32   :  { %553 = vsyncadd [#allocation6], 4294965120 }
  0x33   :  { %554 = dma.done.wait [#allocation9], 2048  }
  0x34   :  { %555 = vsyncadd [#allocation9], 4294965248  ;;  %v566_v0 = vmov 0.0   ;;  %vm567_vm0 = vmmov 0   ;;  %v111_v1 = vld [vmem:[#allocation8 + $0x78] sm:$0xff]  ;;  %v110_v3 = vld [vmem:[#allocation8 + $0x70] sm:$0xff] }
  0x35   :  { %342 = vmatprep.subr.mxu0 %v566_v0  ;;  %377 = vmatprep.subr.mxu1 %v566_v0  ;;  %v94_v2 = vld [vmem:[#allocation7 + $0x78] sm:$0xff]  ;;  %v93_v4 = vld [vmem:[#allocation7 + $0x70] sm:$0xff]  ;;  %v109_v5 = vld [vmem:[#allocation8 + $0x68] sm:$0xff]  ;;  %s568_s23 = smov [#allocation11]  }
  0x36   :  { %374 = vmatprep.mubr.msk.f32.mxu0 %vm567_vm0, %v566_v0  ;;  %409 = vmatprep.mubr.msk.f32.mxu1 %vm567_vm0, %v566_v0  ;;  %v92_v6 = vld [vmem:[#allocation7 + $0x68] sm:$0xff]  ;;  %v108_v7 = vld [vmem:[#allocation8 + $0x60] sm:$0xff]  ;;  %v107_v9 = vld [vmem:[#allocation8 + $0x58] sm:$0xff]  ;;  %s291_s24 = sshll.u32 %s568_s23, 4  ;;  %s292_s24 = int_to_ptr.vmem [resolvable:$true] %s291_s24 }
  0x37   :  { %343 = vmatpush3.msra.mxu0 %v111_v1  ;;  %378 = vmatpush3.msra.mxu1 %v94_v2  ;;  %v91_v8 = vld [vmem:[#allocation7 + $0x60] sm:$0xff]  ;;  %v90_v10 = vld [vmem:[#allocation7 + $0x58] sm:$0xff]  ;;  %v106_v11 = vld [vmem:[#allocation8 + $0x50] sm:$0xff]  ;;  %p515_p7 = scmp.lt.s32.totalorder %s292_s24, %s292_s24 }
  0x38   :  { %344 = vmatprep.subr.mxu0 %v566_v0  ;;  %379 = vmatprep.subr.mxu1 %v566_v0  ;;  %v89_v12 = vld [vmem:[#allocation7 + $0x50] sm:$0xff]  ;;  %v105_v13 = vld [vmem:[#allocation8 + $0x48] sm:$0xff]  ;;  %v104_v15 = vld [vmem:[#allocation8 + $0x40] sm:$0xff] }
  0x39   :  { %345 = vmatpush3.msra.mxu0 %v110_v3  ;;  %380 = vmatpush3.msra.mxu1 %v93_v4  ;;  %v88_v14 = vld [vmem:[#allocation7 + $0x48] sm:$0xff]  ;;  %v87_v16 = vld [vmem:[#allocation7 + $0x40] sm:$0xff]  ;;  %v103_v17 = vld [vmem:[#allocation8 + $0x38] sm:$0xff] }
  0x3a   :  { %346 = vmatprep.subr.mxu0 %v566_v0  ;;  %381 = vmatprep.subr.mxu1 %v566_v0  ;;  %v86_v18 = vld [vmem:[#allocation7 + $0x38] sm:$0xff]  ;;  %v102_v19 = vld [vmem:[#allocation8 + $0x30] sm:$0xff]  ;;  %v101_v21 = vld [vmem:[#allocation8 + $0x28] sm:$0xff] }
  0x3b   :  { %347 = vmatpush3.msra.mxu0 %v109_v5  ;;  %382 = vmatpush3.msra.mxu1 %v92_v6  ;;  %v85_v20 = vld [vmem:[#allocation7 + $0x30] sm:$0xff]  ;;  %v84_v22 = vld [vmem:[#allocation7 + $0x28] sm:$0xff]  ;;  %v100_v23 = vld [vmem:[#allocation8 + $0x20] sm:$0xff] }
  0x3c   :  { %348 = vmatprep.subr.mxu0 %v566_v0  ;;  %383 = vmatprep.subr.mxu1 %v566_v0  ;;  %v83_v24 = vld [vmem:[#allocation7 + $0x20] sm:$0xff]  ;;  %v99_v25 = vld [vmem:[#allocation8 + $0x18] sm:$0xff]  ;;  %v98_v27 = vld [vmem:[#allocation8 + $0x10] sm:$0xff] }
  0x3d   :  { %349 = vmatpush3.msra.mxu0 %v108_v7  ;;  %384 = vmatpush3.msra.mxu1 %v91_v8  ;;  %v82_v26 = vld [vmem:[#allocation7 + $0x18] sm:$0xff]  ;;  %v81_v28 = vld [vmem:[#allocation7 + $0x10] sm:$0xff]  ;;  %v97_v29 = vld [vmem:[#allocation8 + $0x8] sm:$0xff] }
  0x3e   :  { %350 = vmatprep.subr.mxu0 %v566_v0  ;;  %385 = vmatprep.subr.mxu1 %v566_v0  ;;  %v80_v30 = vld [vmem:[#allocation7 + $0x8] sm:$0xff]  ;;  %v96_v31 = vld [vmem:[#allocation8] sm:$0xff]  ;;  %v95_v33 = vld [vmem:[#allocation5] sm:$0xff] }
  0x3f   :  { %351 = vmatpush3.msra.mxu0 %v107_v9  ;;  %386 = vmatpush3.msra.mxu1 %v90_v10  ;;  %v79_v32 = vld [vmem:[#allocation7] sm:$0xff]  ;;  %v78_v34 = vld [vmem:[#allocation2] sm:$0xff] }
  0x40   :  { %352 = vmatprep.subr.mxu0 %v566_v0  ;;  %387 = vmatprep.subr.mxu1 %v566_v0  ;;  %v306_v37 = vld [vmem:[%s672_s4] ss:$0 sm:$0xff]  ;;  %s510_s4 = scalar_lea.vmem %s292_s24, 128 }
  0x41   :  { %353 = vmatpush3.msra.mxu0 %v106_v11  ;;  %388 = vmatpush3.msra.mxu1 %v89_v12  ;;  %v267_v46 = vld [vmem:[%s673_s5] sm:$0xff]  ;;  %p511_p6 = scmp.ne.s32.totalorder %s292_s24, %s510_s4  ;;  %p516_p8 = scmp.lt.s32.totalorder %s510_s4, %s510_s4 }
  0x42   :  { %354 = vmatprep.subr.mxu0 %v566_v0  ;;  %389 = vmatprep.subr.mxu1 %v566_v0 }
  0x43   :  { %355 = vmatpush3.msra.mxu0 %v105_v13  ;;  %390 = vmatpush3.msra.mxu1 %v88_v14  ;;  %p517_p9 = por %p516_p8, %p515_p7 }
  0x44   :  { %356 = vmatprep.subr.mxu0 %v566_v0  ;;  %391 = vmatprep.subr.mxu1 %v566_v0 }
  0x45   :  { %357 = vmatpush3.msra.mxu0 %v104_v15  ;;  %392 = vmatpush3.msra.mxu1 %v87_v16  ;;  %p518_p10 = pnand %p517_p9, %p511_p6 }
  0x46   :  { %358 = vmatprep.subr.mxu0 %v566_v0  ;;  %393 = vmatprep.subr.mxu1 %v566_v0 }
  0x47   :  { %359 = vmatpush3.msra.mxu0 %v103_v17  ;;  %394 = vmatpush3.msra.mxu1 %v86_v18 }
  0x48   :  { %360 = vmatprep.subr.mxu0 %v566_v0  ;;  %395 = vmatprep.subr.mxu1 %v566_v0 }
  0x49   :  { %361 = vmatpush3.msra.mxu0 %v102_v19  ;;  %396 = vmatpush3.msra.mxu1 %v85_v20 }
  0x4a   :  { %362 = vmatprep.subr.mxu0 %v566_v0  ;;  %397 = vmatprep.subr.mxu1 %v566_v0 }
  0x4b   :  { %363 = vmatpush3.msra.mxu0 %v101_v21  ;;  %398 = vmatpush3.msra.mxu1 %v84_v22 }
  0x4c   :  { %364 = vmatprep.subr.mxu0 %v566_v0  ;;  %399 = vmatprep.subr.mxu1 %v566_v0 }
  0x4d   :  { %365 = vmatpush3.msra.mxu0 %v100_v23  ;;  %400 = vmatpush3.msra.mxu1 %v83_v24 }
  0x4e   :  { %366 = vmatprep.subr.mxu0 %v566_v0  ;;  %401 = vmatprep.subr.mxu1 %v566_v0 }
  0x4f   :  { %367 = vmatpush3.msra.mxu0 %v99_v25  ;;  %402 = vmatpush3.msra.mxu1 %v82_v26 }
  0x50   :  { %368 = vmatprep.subr.mxu0 %v566_v0  ;;  %403 = vmatprep.subr.mxu1 %v566_v0 }
  0x51   :  { %369 = vmatpush3.msra.mxu0 %v98_v27  ;;  %404 = vmatpush3.msra.mxu1 %v81_v28 }
  0x52   :  { %370 = vmatprep.subr.mxu0 %v566_v0  ;;  %405 = vmatprep.subr.mxu1 %v566_v0 }
  0x53   :  { %371 = vmatpush3.msra.mxu0 %v97_v29  ;;  %406 = vmatpush3.msra.mxu1 %v80_v30 }
  0x54   :  { %372 = vmatprep.subr.mxu0 %v566_v0  ;;  %407 = vmatprep.subr.mxu1 %v566_v0 }
  0x55   :  { %373 = vmatpush3.msra.mxu0 %v96_v31  ;;  %408 = vmatpush3.msra.mxu1 %v79_v32 }
  0x56   :  { %375 = vmatmul.mubr.f32.vlgmr.msra.gmra.mxu0 %v95_v33  ;;  %410 = vmatmul.mubr.f32.vlgmr.msra.gmra.mxu1 %v78_v34 }
 0x116   :  { %v178_v35 = vpop.f32.mrf.mxu0  ;;  %v248_v36 = vpop.f32.mrf.mxu1 }
 0x117   :  { %v249_v38 = vadd.f32 %v248_v36, %v178_v35 }
 0x118   :  { %v376_v39 = vpop.f32.mrf.mxu0  ;;  %v411_v40 = vpop.f32.mrf.mxu1 }
 0x119   :  { %v259_v41 = vadd.f32 %v306_v37, %v249_v38 }
 0x11b   :  { %v307_v42 = vmul.f32 -1.442695, %v259_v41 }
 0x11d   :  { %422 = vpow2.f32 %v307_v42 }
 0x11e   :  { %424 = vtanh.f32 %v259_v41 }
 0x12a   :  { %v423_v43 = vpop.eup %422 }
 0x12b   :  { %v263_v44 = vadd.f32 1.0, %v423_v43  ;;  %v425_v45 = vpop.eup %424 }
 0x12c   :  { %v269_v49 = vmul.f32 %v425_v45, %v425_v45 }
 0x12d   :  { %426 = vrcp.f32 %v263_v44 }
 0x13a   :  { %v427_v47 = vpop.eup %426 }
 0x13b   :  { %v268_v48 = vmul.f32 %v427_v47, %v267_v46 }
 0x13d   :  { %v270_v50 = vadd.f32 %v269_v49, %v268_v48 }
 0x13f   :  { %428 = vtanh.f32 %v270_v50  ;;  %274 = vst [vmem:[#allocation11] sm:$0xff] %v270_v50 }
 0x140   :  { %521 = shalt.err (!%p518_p10)
}
 0x141   :  { %294 = dma.vmem_to_hbm [thread:$0]  %s292_s24, 128, %s675_s7, [#allocation12]  }
 0x142   :  { %s569_s5 = smov [#allocation10]  }
 0x143   :  { %s281_s27 = sshll.u32 %s569_s5, 4  ;;  %s282_s27 = int_to_ptr.vmem [resolvable:$true] %s281_s27 }
 0x144   :  { %s530_s28 = scalar_lea.vmem %s282_s27, 128  ;;  %p535_p12 = scmp.lt.s32.totalorder %s282_s27, %s282_s27 }
 0x145   :  { %p531_p11 = scmp.ne.s32.totalorder %s282_s27, %s530_s28  ;;  %p536_p13 = scmp.lt.s32.totalorder %s530_s28, %s530_s28 }
 0x147   :  { %p537_p0 = por %p536_p13, %p535_p12 }
 0x149   :  { %p538_p1 = pnand %p537_p0, %p531_p11 }
 0x14c   :  { %v429_v51 = vpop.eup %428 }
 0x14d   :  { %v272_v52 = vmul.f32 %v429_v51, %v427_v47 }
 0x14f   :  { %273 = vst [vmem:[#allocation10] sm:$0xff] %v272_v52 }
 0x150   :  { %541 = shalt.err (!%p538_p1)
}
 0x151   :  { %284 = dma.vmem_to_hbm [thread:$0]  %s282_s27, 128, %s674_s6, [#allocation4]  }
 0x152   :  { %556 = dma.done.wait [#allocation4], 128  }
 0x153   :  { %557 = vsyncadd [#allocation4], 4294967168 }
 0x154   :  { %558 = dma.done.wait [#allocation12], 128  }
 0x155   :  { %559 = vsyncadd [#allocation12], 4294967168 }
 0x156   :  { %301 = vsyncpa [#allocation3], 1 }
 0x157   :  { %302 = vsyncpa [#allocation6], 1 }
 0x158   :  { %303 = vsyncpa [#allocation9], 1 }
 0x159   :  { %304 = vsyncpa [#allocation4], 1 }
 0x15a   :  { %305 = vsyncpa [#allocation12], 1 }

</bundles_post_ra>
